<compile_context>
chip_gen: v6e
topology: v6e:2x2x1
jax: 0.10.0
libtpu: 0.0.40
codegen_flags: <defaults>
</compile_context>

<pallas_src>
import functools

import jax
import jax.numpy as jnp
from jax.experimental import pallas as pl
from jax.experimental.pallas import tpu as pltpu

TEMPERATURE_FOR_L_UAX = 0.07


def _round_up(a, b):
    return (a + b - 1) // b * b


def _cdiv(a, b):
    return (a + b - 1) // b


def _top1gate_kernel(num_tokens, tile_t,
                     inv_gt_ref, x_ref, wredT_ref, wnT_ref,
                     idx_ref, stats_ref):
    """Per-tile Top1Gate forward.

    inv_gt_ref : (1,)        f32 SMEM  1 / clamp(gating_t, 1e-4)
    x_ref      : (TILE_T, D)     VMEM  token tile, streamed in its native dtype
    wredT_ref  : (D, Rp)         VMEM  wg_reduction.weight^T (x dtype), zero-padded
    wnT_ref    : (Rp, E)     f32 VMEM  L2-normalized wg.weight[survive]^T, zero-padded
    idx_ref    : (1, TILE_T) i32       top-1 expert per token (lane-dense)
    stats_ref  : (1, SW)     f32       lanes [0:E]=me partial, [E:2E]=counts, [2E]=entropy
    """
    i = pl.program_id(0)
    n_exp = wnT_ref.shape[1]
    sw = stats_ref.shape[1]
    tt = tile_t

    # --- wg_reduction: x @ w_red^T, streamed dtype -> f32 accumulation on MXU ---
    xr = jnp.dot(x_ref[...], wredT_ref[...],
                 preferred_element_type=jnp.float32)          # (tt, Rp) f32

    # --- token-side L2 normalize (F.normalize p=2, eps=1e-4):
    #     x / max(||x||, 1e-4) == x * rsqrt(max(sum(x^2), 1e-8)); one EUP rsqrt
    #     per token, broadcast multiply on the VPU. Padded Rp columns are zero
    #     so they affect neither the norm nor the logits.
    sumsq = jnp.sum(xr * xr, axis=1, keepdims=True)           # (tt, 1)
    xn = xr * jax.lax.rsqrt(jnp.maximum(sumsq, 1e-8))         # (tt, Rp)

    # --- cosine logits: canonical (M,K)@(K,N) on the MXU (no transpose of the
    #     big (tt, Rp) operand); only the small (tt, E) result is transposed so
    #     post-processing runs token-major-on-lanes.
    lt = jnp.dot(xn, wnT_ref[...], preferred_element_type=jnp.float32)   # (tt, E)
    logits = lt.T                                             # (E, tt)

    # --- validity mask for the (possibly ragged) last tile, lane-dense ---------
    lane = jax.lax.broadcasted_iota(jnp.int32, (1, tt), 1)
    valid_b = (i * tt + lane) < num_tokens                    # (1, tt) bool
    valid_f = valid_b.astype(jnp.float32)

    # --- _make_finite: replace non-finite with min of finite (valid) entries ---
    # TODO(synk): replacement value is the per-tile finite min, not the global
    #             min over all tokens (identical whenever logits are finite).
    ok = jnp.isfinite(logits)
    finite_min = jnp.min(jnp.where(ok & valid_b, logits, jnp.inf))
    logits = jnp.where(ok, logits, finite_min)                # finite everywhere

    # --- metadata: entropy(probs=gates), gates == raw logits (fairseq quirk) ---
    f32_eps = jnp.finfo(jnp.float32).eps
    p_clamped = jnp.clip(logits, f32_eps, 1.0 - f32_eps)
    ent_tok = -jnp.sum(logits * jnp.log(p_clamped), axis=0, keepdims=True)  # (1, tt)
    ent_sum = jnp.sum(ent_tok * valid_f)

    # --- greedy top-1 on sigmoid(logits * (1/gating_t)) -----------------------
    gates1_s = jax.nn.sigmoid(logits * inv_gt_ref[0])         # (E, tt)
    eids = jax.lax.broadcasted_iota(jnp.int32, (n_exp, tt), 0)
    max_val = jnp.max(gates1_s, axis=0, keepdims=True)
    is_max = gates1_s >= max_val
    # first occurrence of the max (matches torch.topk tie behaviour)
    expert_idx = jnp.min(jnp.where(is_max, eids, n_exp), axis=0, keepdims=True)
    idx_ref[...] = expert_idx                                 # (1, tt) lane-dense

    one_hot = (eids == expert_idx).astype(jnp.float32)        # (E, tt)

    # --- softmax(logits / 0.07) over experts (lane-dense elementwise) ---------
    # TODO(synk): pl.reciprocal(approx=True) perturbs me (and hence l_aux) at
    #             ~1e-3 relative; acceptable for a balancing loss.
    z = logits * (1.0 / TEMPERATURE_FOR_L_UAX)
    z = z - jnp.max(z, axis=0, keepdims=True)
    ez = jnp.exp(z)
    gates = ez * pl.reciprocal(jnp.sum(ez, axis=0, keepdims=True), approx=True)

    # --- per-tile partial stats, one unmasked lane-dense 128-wide store -------
    # token-axis reductions done as (1,tt) x (E,tt)^T dots -> lane-major (1, E)
    contract = (((1,), (1,)), ((), ()))
    me_row = jax.lax.dot_general(valid_f, gates, contract,
                                 preferred_element_type=jnp.float32)     # (1, E)
    cnt_row = jax.lax.dot_general(valid_f, one_hot, contract,
                                  preferred_element_type=jnp.float32)    # (1, E)
    ent_row = jnp.reshape(ent_sum, (1, 1))
    pad_row = jnp.zeros((1, sw - 2 * n_exp - 1), jnp.float32)
    stats_ref[...] = jnp.concatenate([me_row, cnt_row, ent_row, pad_row], axis=1)

    # TODO(synk): for large E (>= 64) the post-logits stage should process the
    #             token-lane axis in 128-lane chunks (lax.fori_loop, unroll=True)
    #             to bound live (E, tile) temporaries within the 64-vreg file.


def top1_gate_forward(x, params, survive_expert_indices=None, var_coef=0.0,
                      tile_tokens=512):
    """JAX/Pallas replica of Top1Gate.forward (single-worker world).

    Returns (l_aux, sort_by_expert, input_splits, output_splits, metadata).
    """
    wred_w = params["wg_reduction_weight"]   # (R, D)
    wg_w = params["wg_weight"]               # (num_experts, R)

    # _get_gating_temperature: clamp below eps. Kept traceable (no .item()) and
    # delivered to the kernel through SMEM so a learnable gating_t never gets
    # baked into the compiled kernel.
    gt = jnp.maximum(jnp.asarray(params["gating_t"], jnp.float32).reshape(()), 1e-4)
    inv_gt = (1.0 / gt).reshape(1).astype(jnp.float32)

    if survive_expert_indices is None:
        survive_expert_indices = list(range(wg_w.shape[0]))
    wg_dropped = wg_w[jnp.asarray(survive_expert_indices, jnp.int32)]   # (E, R)

    T, D = x.shape
    R = wred_w.shape[0]
    E = wg_dropped.shape[0]

    # ---- hoisted layout / normalization work (zero numerical change) ---------
    # wg_reduction weight matches the streamed activation dtype (bf16 x ->
    # bf16 weight -> full-rate bf16 MXU path); accumulation stays f32 in-kernel.
    w_red_t = wred_w.T.astype(x.dtype)                                   # (D, R)
    wn = wg_dropped.astype(jnp.float32)
    wn = wn / jnp.maximum(jnp.sqrt(jnp.sum(wn * wn, axis=1, keepdims=True)), 1e-4)
    r_pad = max(_round_up(R, 128), 128)
    if r_pad != R:
        w_red_t = jnp.pad(w_red_t, ((0, 0), (0, r_pad - R)))
        wn = jnp.pad(wn, ((0, 0), (0, r_pad - R)))
    wn_t = wn.T                                                          # (Rp, E) f32

    # ---- token tiling: no wrapper-side pad/copy of x; ragged tail handled by
    #      the in-kernel valid mask + masked output writeback. -----------------
    if T <= tile_tokens:
        # keep >= 2 tiles once there is enough work so both TensorCores of a
        # v7x megacore get a share of the "parallel" grid axis.
        tile = _round_up(_cdiv(T, 2), 128) if T >= 256 else T
    else:
        tile = _round_up(min(tile_tokens, T), 128)
    num_tiles = _cdiv(T, tile)

    sw = max(_round_up(2 * E + 1, 128), 128)        # consolidated stats row width

    # ---- generation-aware VMEM budget ----------------------------------------
    x_bytes = jnp.dtype(x.dtype).itemsize
    w_bytes = jnp.dtype(w_red_t.dtype).itemsize
    est = (2 * tile * D * x_bytes                   # double-buffered streamed x tile
           + D * r_pad * w_bytes                    # resident wredT (single buffer)
           + r_pad * E * 4                          # resident wnT   (single buffer)
           + 4 * tile * r_pad * 4                   # xr / xn f32 temporaries
           + 16 * tile * 128 * 4                    # (E,tile)/(tile,E) temporaries
           + 2 * (tile + sw) * 4 * 2                # output blocks
           + (2 << 20))                             # slack
    try:
        phys = int(pltpu.get_tpu_info().vmem_capacity_bytes)
    except Exception:
        phys = 128 << 20                            # v5e/v6e; v7x reports 64 MiB
    vmem_cap = max(phys - (16 << 20), 16 << 20)     # headroom for compiler scratch
    vmem_limit = int(min(max(est, 16 << 20), vmem_cap))

    kernel = functools.partial(_top1gate_kernel, int(T), int(tile))

    out_shape = (
        jax.ShapeDtypeStruct((1, T), jnp.int32),              # top-1 expert per token
        jax.ShapeDtypeStruct((num_tiles, sw), jnp.float32),   # per-tile stats rows
    )

    def _call(single_buffer_weights):
        w_kwargs = dict(pipeline_mode=pl.Buffered(1)) if single_buffer_weights else {}
        in_specs = [
            pl.BlockSpec(memory_space=pltpu.MemorySpace.SMEM),        # inv_gt scalar
            pl.BlockSpec((tile, D), lambda i: (i, 0)),                # streamed x tile
            pl.BlockSpec((D, r_pad), lambda i: (0, 0), **w_kwargs),   # resident weights
            pl.BlockSpec((r_pad, E), lambda i: (0, 0), **w_kwargs),
        ]
        out_specs = (
            pl.BlockSpec((1, tile), lambda i: (0, i)),                # lane-dense idx
            pl.BlockSpec((1, sw), lambda i: (i, 0)),                  # lane-dense stats
        )
        return pl.pallas_call(
            kernel,
            out_shape=out_shape,
            grid=(num_tiles,),
            in_specs=in_specs,
            out_specs=out_specs,
            compiler_params=pltpu.CompilerParams(
                dimension_semantics=("parallel",),
                vmem_limit_bytes=vmem_limit),
        )(inv_gt, x, w_red_t, wn_t)

    try:
        idx_out, stats = _call(True)
    except Exception:
        # TODO(synk): pl.Buffered(1) (single-buffered constant weight blocks) may be
        #             rejected by older jax versions; fall back to default buffering.
        idx_out, stats = _call(False)

    # ---- tiny cross-tile reductions + l_aux formula (plain JAX) --------------
    # Reference uses torch.sum over tokens for me (not a mean) — kept as a sum.
    me = jnp.sum(stats[:, 0:E], axis=0)                       # (E,) f32
    counts_f = jnp.sum(stats[:, E:2 * E], axis=0)             # (E,) f32 (exact ints)
    counts = counts_f.astype(jnp.int32)
    ent_mean = jnp.sum(stats[:, 2 * E]) / T

    ce = counts_f / jnp.sum(counts_f) + 1e-6                  # (E,)
    # coef_type == 0: unbiased variance of me (torch.var default)
    if E > 1:
        me_mean = jnp.mean(me)
        var = jnp.sum((me - me_mean) ** 2) / (E - 1)
    else:
        var = jnp.float32(0.0)
    l_aux = (jnp.dot(me, ce) + var_coef * var) * E

    # ---- greedy_assignment glue (plain JAX; world_size == 1) -----------------
    token_to_workers = idx_out[0, :]
    sort_by_expert = jnp.argsort(token_to_workers)            # worker2token (k=1)
    output_splits = counts.reshape(1, E)                      # (num_workers=1, E)
    # TODO(synk): _All2All_with_split / dist.all_gather are identity for a
    #             single-worker world; multi-host splits exchange not modeled.
    input_splits = output_splits

    metadata = {"entropy_gating": ent_mean}
    return l_aux, sort_by_expert, input_splits, output_splits, metadata


def init_params(key, model_dim, routing_dim, num_experts):
    """Deterministic parameter init mirroring Top1Gate.__init__."""
    k1, k2 = jax.random.split(key)
    # wg_reduction: nn.Linear(model_dim, routing_dim, bias=False)
    bound = 1.0 / jnp.sqrt(model_dim)
    wred_w = jax.random.uniform(k1, (routing_dim, model_dim), jnp.float32,
                                -bound, bound)
    # wg: nn.Linear(routing_dim, num_experts, bias=False), orthogonal_(gain=0.1)
    a = jax.random.normal(k2, (routing_dim, num_experts), jnp.float32)
    q, _ = jnp.linalg.qr(a)                 # (R, E), orthonormal columns (E<=R)
    wg_w = 0.1 * q.T                        # (E, R) with orthonormal rows * gain
    return {
        "wg_reduction_weight": wred_w,
        "wg_weight": wg_w,
        "gating_t": 0.07,                   # registered parameter init value
    }


if __name__ == "__main__":
    key = jax.random.PRNGKey(0)
    k_x, k_p, k_x2, k_x3 = jax.random.split(key, 4)

    model_dim = 32
    routing_dim = 16
    num_experts = 8

    params = init_params(k_p, model_dim, routing_dim, num_experts)

    # small single-tile case (f32)
    x1 = jax.random.normal(k_x, (16, model_dim), jnp.float32)
    l1, s1, isp1, osp1, m1 = top1_gate_forward(
        x1, params, survive_expert_indices=list(range(num_experts)), var_coef=0.0)

    # multi-tile case with a ragged tail tile (no wrapper-side pad of x)
    x2 = jax.random.normal(k_x2, (600, model_dim), jnp.float32)
    l2, s2, isp2, osp2, m2 = top1_gate_forward(
        x2, params, var_coef=0.1, tile_tokens=256)

    # bf16 activations (native bf16 streaming + bf16 MXU path, 2-tile split)
    x3 = jax.random.normal(k_x3, (384, model_dim), jnp.bfloat16)
    l3, s3, isp3, osp3, m3 = top1_gate_forward(x3, params, var_coef=0.0)

    jax.block_until_ready((l1, s1, isp1, osp1, m1["entropy_gating"],
                           l2, s2, isp2, osp2, m2["entropy_gating"],
                           l3, s3, isp3, osp3, m3["entropy_gating"]))
    print("KERNEL_OK")
</pallas_src>

<mosaic_0001>
module attributes {stable_mosaic.version = 11 : i64} {
  func.func @_top1gate_kernel(%arg0: i32, %arg1: memref<1xf32, #tpu.memory_space<smem>>, %arg2: memref<16x32xf32, #tpu.memory_space<vmem>>, %arg3: memref<32x128xf32, #tpu.memory_space<vmem>>, %arg4: memref<128x8xf32, #tpu.memory_space<vmem>>, %arg5: memref<1x16xi32, #tpu.memory_space<vmem>>, %arg6: memref<1x128xf32, #tpu.memory_space<vmem>>) attributes {dimension_semantics = [#tpu.dimension_semantics<parallel>], iteration_bounds = array<i64: 1>, scalar_prefetch = 0 : i64, scratch_operands = 0 : i64, tpu.core_type = #tpu.core_type<tc>, window_params = [{transform_indices = @transform_0, window_bounds = array<i64: 1>}, {transform_indices = @transform_1, window_bounds = array<i64: 16, 32>}, {pipeline_mode = #tpu.pipeline_mode<synchronous>, transform_indices = @transform_2, window_bounds = array<i64: 32, 128>}, {pipeline_mode = #tpu.pipeline_mode<synchronous>, transform_indices = @transform_3, window_bounds = array<i64: 128, 8>}, {transform_indices = @transform_4, window_bounds = array<i64: 1, 16>}, {transform_indices = @transform_5, window_bounds = array<i64: 1, 128>}]} {
    %c0 = arith.constant 0 : index
    %c0_0 = arith.constant 0 : index
    %0 = vector.load %arg2[%c0, %c0_0] : memref<16x32xf32, #tpu.memory_space<vmem>>, vector<16x32xf32>
    %c0_1 = arith.constant 0 : index
    %c0_2 = arith.constant 0 : index
    %1 = vector.load %arg3[%c0_1, %c0_2] : memref<32x128xf32, #tpu.memory_space<vmem>>, vector<32x128xf32>
    %cst = arith.constant dense<0.000000e+00> : vector<16x128xf32>
    %2 = tpu.matmul %0, %1, %cst {dimension_numbers = #tpu.dot_dimension_numbers<[1], [0], [0], [1], [0, 0, 1, 1], [], []>} : vector<16x32xf32>, vector<32x128xf32>, vector<16x128xf32> -> vector<16x128xf32>
    %3 = arith.mulf %2, %2 : vector<16x128xf32>
    %cst_3 = arith.constant dense<0.000000e+00> : vector<16xf32>
    %4 = vector.multi_reduction <add>, %3, %cst_3 [1] : vector<16x128xf32> to vector<16xf32>
    %5 = vector.shape_cast %4 : vector<16xf32> to vector<16x1xf32>
    %cst_4 = arith.constant 9.99999993E-9 : f32
    %6 = vector.broadcast %cst_4 : f32 to vector<16x1xf32>
    %7 = arith.maximumf %5, %6 : vector<16x1xf32>
    %8 = math.rsqrt %7 : vector<16x1xf32>
    %9 = vector.broadcast %8 : vector<16x1xf32> to vector<16x128xf32>
    %10 = arith.mulf %2, %9 : vector<16x128xf32>
    %c0_5 = arith.constant 0 : index
    %c0_6 = arith.constant 0 : index
    %11 = vector.load %arg4[%c0_5, %c0_6] : memref<128x8xf32, #tpu.memory_space<vmem>>, vector<128x8xf32>
    %cst_7 = arith.constant dense<0.000000e+00> : vector<16x8xf32>
    %12 = tpu.matmul %10, %11, %cst_7 {dimension_numbers = #tpu.dot_dimension_numbers<[1], [0], [0], [1], [0, 0, 1, 1], [], []>} : vector<16x128xf32>, vector<128x8xf32>, vector<16x8xf32> -> vector<16x8xf32>
    %13 = tpu.transpose %12, [1, 0] : vector<16x8xf32> -> vector<8x16xf32>
    %14 = tpu.iota {dimensions = array<i32: 1>} : vector<1x16xi32>
    %c16_i32 = arith.constant 16 : i32
    %15 = arith.muli %arg0, %c16_i32 : i32
    %16 = vector.broadcast %15 : i32 to vector<1x16xi32>
    %17 = arith.addi %16, %14 : vector<1x16xi32>
    %c16_i32_8 = arith.constant 16 : i32
    %18 = vector.broadcast %c16_i32_8 : i32 to vector<1x16xi32>
    %19 = arith.cmpi slt, %17, %18 : vector<1x16xi32>
    %20 = arith.extui %19 : vector<1x16xi1> to vector<1x16xi32>
    %21 = arith.sitofp %20 : vector<1x16xi32> to vector<1x16xf32>
    %22 = tpu.weird %13 : vector<8x16xf32> -> vector<8x16xi1>
    %cst_9 = arith.constant dense<true> : vector<8x16xi1>
    %23 = arith.xori %22, %cst_9 : vector<8x16xi1>
    %24 = vector.broadcast %19 : vector<1x16xi1> to vector<8x16xi1>
    %25 = arith.andi %23, %24 : vector<8x16xi1>
    %cst_10 = arith.constant 0x7F800000 : f32
    %26 = vector.broadcast %cst_10 : f32 to vector<8x16xf32>
    %27 = arith.select %25, %13, %26 : vector<8x16xi1>, vector<8x16xf32>
    %28 = vector.shape_cast %27 : vector<8x16xf32> to vector<1x8x16xf32>
    %cst_11 = arith.constant dense<0x7F800000> : vector<1xf32>
    %29 = vector.multi_reduction <minimumf>, %28, %cst_11 [1, 2] : vector<1x8x16xf32> to vector<1xf32>
    %30 = vector.shape_cast %29 : vector<1xf32> to vector<1x1x1xf32>
    %31 = vector.extract %30[0, 0, 0] : f32 from vector<1x1x1xf32>
    %32 = vector.broadcast %31 : f32 to vector<8x16xf32>
    %33 = arith.select %23, %13, %32 : vector<8x16xi1>, vector<8x16xf32>
    %cst_12 = arith.constant 1.1920929E-7 : f32
    %cst_13 = arith.constant 0.99999988 : f32
    %34 = vector.broadcast %cst_12 : f32 to vector<8x16xf32>
    %35 = arith.maximumf %34, %33 : vector<8x16xf32>
    %36 = vector.broadcast %cst_13 : f32 to vector<8x16xf32>
    %37 = arith.minimumf %36, %35 : vector<8x16xf32>
    %38 = math.log %37 : vector<8x16xf32>
    %39 = arith.mulf %33, %38 : vector<8x16xf32>
    %cst_14 = arith.constant dense<0.000000e+00> : vector<16xf32>
    %40 = vector.multi_reduction <add>, %39, %cst_14 [0] : vector<8x16xf32> to vector<16xf32>
    %41 = vector.shape_cast %40 : vector<16xf32> to vector<1x16xf32>
    %cst_15 = arith.constant 0.000000e+00 : f32
    %42 = vector.broadcast %cst_15 : f32 to vector<1x16xf32>
    %43 = arith.subf %42, %41 : vector<1x16xf32>
    %44 = arith.mulf %43, %21 : vector<1x16xf32>
    %45 = vector.shape_cast %44 : vector<1x16xf32> to vector<1x1x16xf32>
    %cst_16 = arith.constant dense<0.000000e+00> : vector<1xf32>
    %46 = vector.multi_reduction <add>, %45, %cst_16 [1, 2] : vector<1x1x16xf32> to vector<1xf32>
    %47 = vector.shape_cast %46 : vector<1xf32> to vector<1x1x1xf32>
    %48 = vector.extract %47[0, 0, 0] : f32 from vector<1x1x1xf32>
    %c0_17 = arith.constant 0 : index
    %49 = memref.load %arg1[%c0_17] : memref<1xf32, #tpu.memory_space<smem>>
    %50 = vector.broadcast %49 : f32 to vector<8x16xf32>
    %51 = arith.mulf %33, %50 : vector<8x16xf32>
    %52 = arith.negf %51 : vector<8x16xf32>
    %53 = math.exp %52 : vector<8x16xf32>
    %cst_18 = arith.constant 1.000000e+00 : f32
    %54 = vector.broadcast %cst_18 : f32 to vector<8x16xf32>
    %55 = arith.addf %54, %53 : vector<8x16xf32>
    %56 = arith.divf %54, %55 : vector<8x16xf32>
    %57 = tpu.iota {dimensions = array<i32: 0>} : vector<8x16xi32>
    %cst_19 = arith.constant dense<0xFF800000> : vector<16xf32>
    %58 = vector.multi_reduction <maximumf>, %56, %cst_19 [0] : vector<8x16xf32> to vector<16xf32>
    %59 = vector.shape_cast %58 : vector<16xf32> to vector<1x16xf32>
    %60 = vector.broadcast %59 : vector<1x16xf32> to vector<8x16xf32>
    %61 = arith.cmpf oge, %56, %60 : vector<8x16xf32>
    %c8_i32 = arith.constant 8 : i32
    %62 = vector.broadcast %c8_i32 : i32 to vector<8x16xi32>
    %63 = arith.select %61, %57, %62 : vector<8x16xi1>, vector<8x16xi32>
    %cst_20 = arith.constant dense<2147483647> : vector<16xi32>
    %64 = vector.multi_reduction <minsi>, %63, %cst_20 [0] : vector<8x16xi32> to vector<16xi32>
    %65 = vector.shape_cast %64 : vector<16xi32> to vector<1x16xi32>
    %c0_21 = arith.constant 0 : index
    %c0_22 = arith.constant 0 : index
    %66 = vector.load %arg5[%c0_21, %c0_22] : memref<1x16xi32, #tpu.memory_space<vmem>>, vector<1x16xi32>
    tpu.vector_store %arg5[%c0_21, %c0_22], %65 {strides = array<i32>} : memref<1x16xi32, #tpu.memory_space<vmem>>, vector<1x16xi32>,
    %67 = vector.broadcast %65 : vector<1x16xi32> to vector<8x16xi32>
    %68 = arith.cmpi eq, %57, %67 : vector<8x16xi32>
    %69 = arith.extui %68 : vector<8x16xi1> to vector<8x16xi32>
    %70 = arith.sitofp %69 : vector<8x16xi32> to vector<8x16xf32>
    %cst_23 = arith.constant 14.2857141 : f32
    %71 = vector.broadcast %cst_23 : f32 to vector<8x16xf32>
    %72 = arith.mulf %33, %71 : vector<8x16xf32>
    %cst_24 = arith.constant dense<0xFF800000> : vector<16xf32>
    %73 = vector.multi_reduction <maximumf>, %72, %cst_24 [0] : vector<8x16xf32> to vector<16xf32>
    %74 = vector.shape_cast %73 : vector<16xf32> to vector<1x16xf32>
    %75 = vector.broadcast %74 : vector<1x16xf32> to vector<8x16xf32>
    %76 = arith.subf %72, %75 : vector<8x16xf32>
    %77 = math.exp %76 : vector<8x16xf32>
    %cst_25 = arith.constant dense<0.000000e+00> : vector<16xf32>
    %78 = vector.multi_reduction <add>, %77, %cst_25 [0] : vector<8x16xf32> to vector<16xf32>
    %79 = vector.shape_cast %78 : vector<16xf32> to vector<1x16xf32>
    %80 = tpu.reciprocal %79 {approx = true} : vector<1x16xf32> -> vector<1x16xf32>
    %81 = vector.broadcast %80 : vector<1x16xf32> to vector<8x16xf32>
    %82 = arith.mulf %77, %81 : vector<8x16xf32>
    %cst_26 = arith.constant dense<0.000000e+00> : vector<1x8xf32>
    %83 = tpu.matmul %21, %82, %cst_26 {dimension_numbers = #tpu.dot_dimension_numbers<[1], [1], [0], [0], [0, 0, 1, 0], [], []>} : vector<1x16xf32>, vector<8x16xf32>, vector<1x8xf32> -> vector<1x8xf32>
    %cst_27 = arith.constant dense<0.000000e+00> : vector<1x8xf32>
    %84 = tpu.matmul %21, %70, %cst_27 {dimension_numbers = #tpu.dot_dimension_numbers<[1], [1], [0], [0], [0, 0, 1, 0], [], []>} : vector<1x16xf32>, vector<8x16xf32>, vector<1x8xf32> -> vector<1x8xf32>
    %85 = vector.broadcast %48 : f32 to vector<1x1xf32>
    %cst_28 = arith.constant 0.000000e+00 : f32
    %86 = vector.broadcast %cst_28 : f32 to vector<1x111xf32>
    %87 = tpu.concatenate %83, %84, %85, %86 in 1 : vector<1x8xf32>, vector<1x8xf32>, vector<1x1xf32>, vector<1x111xf32> -> vector<1x128xf32>
    %c0_29 = arith.constant 0 : index
    %c0_30 = arith.constant 0 : index
    %88 = vector.load %arg6[%c0_29, %c0_30] : memref<1x128xf32, #tpu.memory_space<vmem>>, vector<1x128xf32>
    tpu.vector_store %arg6[%c0_29, %c0_30], %87 {strides = array<i32>} : memref<1x128xf32, #tpu.memory_space<vmem>>, vector<1x128xf32>,
    return
  }
  func.func @transform_0(%arg0: i32) -> i32 {
    %c0_i32 = arith.constant 0 : i32
    %c0_i32_0 = arith.constant 0 : i32
    return %c0_i32 : i32
  }
  func.func @transform_1(%arg0: i32) -> (i32, i32) {
    %c0_i32 = arith.constant 0 : i32
    %c0_i32_0 = arith.constant 0 : i32
    return %arg0, %c0_i32 : i32, i32
  }
  func.func @transform_2(%arg0: i32) -> (i32, i32) {
    %c0_i32 = arith.constant 0 : i32
    %c0_i32_0 = arith.constant 0 : i32
    %c0_i32_1 = arith.constant 0 : i32
    return %c0_i32, %c0_i32_0 : i32, i32
  }
  func.func @transform_3(%arg0: i32) -> (i32, i32) {
    %c0_i32 = arith.constant 0 : i32
    %c0_i32_0 = arith.constant 0 : i32
    %c0_i32_1 = arith.constant 0 : i32
    return %c0_i32, %c0_i32_0 : i32, i32
  }
  func.func @transform_4(%arg0: i32) -> (i32, i32) {
    %c0_i32 = arith.constant 0 : i32
    %c0_i32_0 = arith.constant 0 : i32
    return %c0_i32, %arg0 : i32, i32
  }
  func.func @transform_5(%arg0: i32) -> (i32, i32) {
    %c0_i32 = arith.constant 0 : i32
    %c0_i32_0 = arith.constant 0 : i32
    return %arg0, %c0_i32 : i32, i32
  }
}

module attributes {stable_mosaic.version = 11 : i64} {
  func.func @_top1gate_kernel(%arg0: i32, %arg1: memref<1xf32, #tpu.memory_space<smem>>, %arg2: memref<16x32xf32, #tpu.memory_space<vmem>>, %arg3: memref<32x128xf32, #tpu.memory_space<vmem>>, %arg4: memref<128x8xf32, #tpu.memory_space<vmem>>, %arg5: memref<1x16xi32, #tpu.memory_space<vmem>>, %arg6: memref<1x128xf32, #tpu.memory_space<vmem>>) attributes {dimension_semantics = [#tpu.dimension_semantics<parallel>], iteration_bounds = array<i64: 1>, scalar_prefetch = 0 : i64, scratch_operands = 0 : i64, tpu.core_type = #tpu.core_type<tc>, window_params = [{transform_indices = @transform_0, window_bounds = array<i64: 1>}, {transform_indices = @transform_1, window_bounds = array<i64: 16, 32>}, {pipeline_mode = #tpu.pipeline_mode<synchronous>, transform_indices = @transform_2, window_bounds = array<i64: 32, 128>}, {pipeline_mode = #tpu.pipeline_mode<synchronous>, transform_indices = @transform_3, window_bounds = array<i64: 128, 8>}, {transform_indices = @transform_4, window_bounds = array<i64: 1, 16>}, {transform_indices = @transform_5, window_bounds = array<i64: 1, 128>}]} {
    %c0 = arith.constant 0 : index
    %c0_0 = arith.constant 0 : index
    %0 = vector.load %arg2[%c0, %c0_0] : memref<16x32xf32, #tpu.memory_space<vmem>>, vector<16x32xf32>
    %c0_1 = arith.constant 0 : index
    %c0_2 = arith.constant 0 : index
    %1 = vector.load %arg3[%c0_1, %c0_2] : memref<32x128xf32, #tpu.memory_space<vmem>>, vector<32x128xf32>
    %cst = arith.constant dense<0.000000e+00> : vector<16x128xf32>
    %2 = tpu.matmul %0, %1, %cst {dimension_numbers = #tpu.dot_dimension_numbers<[1], [0], [0], [1], [0, 0, 1, 1], [], []>} : vector<16x32xf32>, vector<32x128xf32>, vector<16x128xf32> -> vector<16x128xf32>
    %3 = arith.mulf %2, %2 : vector<16x128xf32>
    %cst_3 = arith.constant dense<0.000000e+00> : vector<16xf32>
    %4 = vector.multi_reduction <add>, %3, %cst_3 [1] : vector<16x128xf32> to vector<16xf32>
    %5 = vector.shape_cast %4 : vector<16xf32> to vector<16x1xf32>
    %cst_4 = arith.constant 9.99999993E-9 : f32
    %6 = vector.broadcast %cst_4 : f32 to vector<16x1xf32>
    %7 = arith.maximumf %5, %6 : vector<16x1xf32>
    %8 = math.rsqrt %7 : vector<16x1xf32>
    %9 = vector.broadcast %8 : vector<16x1xf32> to vector<16x128xf32>
    %10 = arith.mulf %2, %9 : vector<16x128xf32>
    %c0_5 = arith.constant 0 : index
    %c0_6 = arith.constant 0 : index
    %11 = vector.load %arg4[%c0_5, %c0_6] : memref<128x8xf32, #tpu.memory_space<vmem>>, vector<128x8xf32>
    %cst_7 = arith.constant dense<0.000000e+00> : vector<16x8xf32>
    %12 = tpu.matmul %10, %11, %cst_7 {dimension_numbers = #tpu.dot_dimension_numbers<[1], [0], [0], [1], [0, 0, 1, 1], [], []>} : vector<16x128xf32>, vector<128x8xf32>, vector<16x8xf32> -> vector<16x8xf32>
    %13 = tpu.transpose %12, [1, 0] : vector<16x8xf32> -> vector<8x16xf32>
    %14 = tpu.iota {dimensions = array<i32: 1>} : vector<1x16xi32>
    %c16_i32 = arith.constant 16 : i32
    %15 = arith.muli %arg0, %c16_i32 : i32
    %16 = vector.broadcast %15 : i32 to vector<1x16xi32>
    %17 = arith.addi %16, %14 : vector<1x16xi32>
    %c16_i32_8 = arith.constant 16 : i32
    %18 = vector.broadcast %c16_i32_8 : i32 to vector<1x16xi32>
    %19 = arith.cmpi slt, %17, %18 : vector<1x16xi32>
    %20 = arith.extui %19 : vector<1x16xi1> to vector<1x16xi32>
    %21 = arith.sitofp %20 : vector<1x16xi32> to vector<1x16xf32>
    %22 = tpu.weird %13 : vector<8x16xf32> -> vector<8x16xi1>
    %cst_9 = arith.constant dense<true> : vector<8x16xi1>
    %23 = arith.xori %22, %cst_9 : vector<8x16xi1>
    %24 = vector.broadcast %19 : vector<1x16xi1> to vector<8x16xi1>
    %25 = arith.andi %23, %24 : vector<8x16xi1>
    %cst_10 = arith.constant 0x7F800000 : f32
    %26 = vector.broadcast %cst_10 : f32 to vector<8x16xf32>
    %27 = arith.select %25, %13, %26 : vector<8x16xi1>, vector<8x16xf32>
    %28 = vector.shape_cast %27 : vector<8x16xf32> to vector<1x8x16xf32>
    %cst_11 = arith.constant dense<0x7F800000> : vector<1xf32>
    %29 = vector.multi_reduction <minimumf>, %28, %cst_11 [1, 2] : vector<1x8x16xf32> to vector<1xf32>
    %30 = vector.shape_cast %29 : vector<1xf32> to vector<1x1x1xf32>
    %31 = vector.extract %30[0, 0, 0] : f32 from vector<1x1x1xf32>
    %32 = vector.broadcast %31 : f32 to vector<8x16xf32>
    %33 = arith.select %23, %13, %32 : vector<8x16xi1>, vector<8x16xf32>
    %cst_12 = arith.constant 1.1920929E-7 : f32
    %cst_13 = arith.constant 0.99999988 : f32
    %34 = vector.broadcast %cst_12 : f32 to vector<8x16xf32>
    %35 = arith.maximumf %34, %33 : vector<8x16xf32>
    %36 = vector.broadcast %cst_13 : f32 to vector<8x16xf32>
    %37 = arith.minimumf %36, %35 : vector<8x16xf32>
    %38 = math.log %37 : vector<8x16xf32>
    %39 = arith.mulf %33, %38 : vector<8x16xf32>
    %cst_14 = arith.constant dense<0.000000e+00> : vector<16xf32>
    %40 = vector.multi_reduction <add>, %39, %cst_14 [0] : vector<8x16xf32> to vector<16xf32>
    %41 = vector.shape_cast %40 : vector<16xf32> to vector<1x16xf32>
    %cst_15 = arith.constant 0.000000e+00 : f32
    %42 = vector.broadcast %cst_15 : f32 to vector<1x16xf32>
    %43 = arith.subf %42, %41 : vector<1x16xf32>
    %44 = arith.mulf %43, %21 : vector<1x16xf32>
    %45 = vector.shape_cast %44 : vector<1x16xf32> to vector<1x1x16xf32>
    %cst_16 = arith.constant dense<0.000000e+00> : vector<1xf32>
    %46 = vector.multi_reduction <add>, %45, %cst_16 [1, 2] : vector<1x1x16xf32> to vector<1xf32>
    %47 = vector.shape_cast %46 : vector<1xf32> to vector<1x1x1xf32>
    %48 = vector.extract %47[0, 0, 0] : f32 from vector<1x1x1xf32>
    %c0_17 = arith.constant 0 : index
    %49 = memref.load %arg1[%c0_17] : memref<1xf32, #tpu.memory_space<smem>>
    %50 = vector.broadcast %49 : f32 to vector<8x16xf32>
    %51 = arith.mulf %33, %50 : vector<8x16xf32>
    %52 = arith.negf %51 : vector<8x16xf32>
    %53 = math.exp %52 : vector<8x16xf32>
    %cst_18 = arith.constant 1.000000e+00 : f32
    %54 = vector.broadcast %cst_18 : f32 to vector<8x16xf32>
    %55 = arith.addf %54, %53 : vector<8x16xf32>
    %56 = arith.divf %54, %55 : vector<8x16xf32>
    %57 = tpu.iota {dimensions = array<i32: 0>} : vector<8x16xi32>
    %cst_19 = arith.constant dense<0xFF800000> : vector<16xf32>
    %58 = vector.multi_reduction <maximumf>, %56, %cst_19 [0] : vector<8x16xf32> to vector<16xf32>
    %59 = vector.shape_cast %58 : vector<16xf32> to vector<1x16xf32>
    %60 = vector.broadcast %59 : vector<1x16xf32> to vector<8x16xf32>
    %61 = arith.cmpf oge, %56, %60 : vector<8x16xf32>
    %c8_i32 = arith.constant 8 : i32
    %62 = vector.broadcast %c8_i32 : i32 to vector<8x16xi32>
    %63 = arith.select %61, %57, %62 : vector<8x16xi1>, vector<8x16xi32>
    %cst_20 = arith.constant dense<2147483647> : vector<16xi32>
    %64 = vector.multi_reduction <minsi>, %63, %cst_20 [0] : vector<8x16xi32> to vector<16xi32>
    %65 = vector.shape_cast %64 : vector<16xi32> to vector<1x16xi32>
    %c0_21 = arith.constant 0 : index
    %c0_22 = arith.constant 0 : index
    %66 = vector.load %arg5[%c0_21, %c0_22] : memref<1x16xi32, #tpu.memory_space<vmem>>, vector<1x16xi32>
    tpu.vector_store %arg5[%c0_21, %c0_22], %65 {strides = array<i32>} : memref<1x16xi32, #tpu.memory_space<vmem>>, vector<1x16xi32>,
    %67 = vector.broadcast %65 : vector<1x16xi32> to vector<8x16xi32>
    %68 = arith.cmpi eq, %57, %67 : vector<8x16xi32>
    %69 = arith.extui %68 : vector<8x16xi1> to vector<8x16xi32>
    %70 = arith.sitofp %69 : vector<8x16xi32> to vector<8x16xf32>
    %cst_23 = arith.constant 14.2857141 : f32
    %71 = vector.broadcast %cst_23 : f32 to vector<8x16xf32>
    %72 = arith.mulf %33, %71 : vector<8x16xf32>
    %cst_24 = arith.constant dense<0xFF800000> : vector<16xf32>
    %73 = vector.multi_reduction <maximumf>, %72, %cst_24 [0] : vector<8x16xf32> to vector<16xf32>
    %74 = vector.shape_cast %73 : vector<16xf32> to vector<1x16xf32>
    %75 = vector.broadcast %74 : vector<1x16xf32> to vector<8x16xf32>
    %76 = arith.subf %72, %75 : vector<8x16xf32>
    %77 = math.exp %76 : vector<8x16xf32>
    %cst_25 = arith.constant dense<0.000000e+00> : vector<16xf32>
    %78 = vector.multi_reduction <add>, %77, %cst_25 [0] : vector<8x16xf32> to vector<16xf32>
    %79 = vector.shape_cast %78 : vector<16xf32> to vector<1x16xf32>
    %80 = tpu.reciprocal %79 {approx = true} : vector<1x16xf32> -> vector<1x16xf32>
    %81 = vector.broadcast %80 : vector<1x16xf32> to vector<8x16xf32>
    %82 = arith.mulf %77, %81 : vector<8x16xf32>
    %cst_26 = arith.constant dense<0.000000e+00> : vector<1x8xf32>
    %83 = tpu.matmul %21, %82, %cst_26 {dimension_numbers = #tpu.dot_dimension_numbers<[1], [1], [0], [0], [0, 0, 1, 0], [], []>} : vector<1x16xf32>, vector<8x16xf32>, vector<1x8xf32> -> vector<1x8xf32>
    %cst_27 = arith.constant dense<0.000000e+00> : vector<1x8xf32>
    %84 = tpu.matmul %21, %70, %cst_27 {dimension_numbers = #tpu.dot_dimension_numbers<[1], [1], [0], [0], [0, 0, 1, 0], [], []>} : vector<1x16xf32>, vector<8x16xf32>, vector<1x8xf32> -> vector<1x8xf32>
    %85 = vector.broadcast %48 : f32 to vector<1x1xf32>
    %cst_28 = arith.constant 0.000000e+00 : f32
    %86 = vector.broadcast %cst_28 : f32 to vector<1x111xf32>
    %87 = tpu.concatenate %83, %84, %85, %86 in 1 : vector<1x8xf32>, vector<1x8xf32>, vector<1x1xf32>, vector<1x111xf32> -> vector<1x128xf32>
    %c0_29 = arith.constant 0 : index
    %c0_30 = arith.constant 0 : index
    %88 = vector.load %arg6[%c0_29, %c0_30] : memref<1x128xf32, #tpu.memory_space<vmem>>, vector<1x128xf32>
    tpu.vector_store %arg6[%c0_29, %c0_30], %87 {strides = array<i32>} : memref<1x128xf32, #tpu.memory_space<vmem>>, vector<1x128xf32>,
    return
  }
  func.func @transform_0(%arg0: i32) -> i32 {
    %c0_i32 = arith.constant 0 : i32
    %c0_i32_0 = arith.constant 0 : i32
    return %c0_i32 : i32
  }
  func.func @transform_1(%arg0: i32) -> (i32, i32) {
    %c0_i32 = arith.constant 0 : i32
    %c0_i32_0 = arith.constant 0 : i32
    return %arg0, %c0_i32 : i32, i32
  }
  func.func @transform_2(%arg0: i32) -> (i32, i32) {
    %c0_i32 = arith.constant 0 : i32
    %c0_i32_0 = arith.constant 0 : i32
    %c0_i32_1 = arith.constant 0 : i32
    return %c0_i32, %c0_i32_0 : i32, i32
  }
  func.func @transform_3(%arg0: i32) -> (i32, i32) {
    %c0_i32 = arith.constant 0 : i32
    %c0_i32_0 = arith.constant 0 : i32
    %c0_i32_1 = arith.constant 0 : i32
    return %c0_i32, %c0_i32_0 : i32, i32
  }
  func.func @transform_4(%arg0: i32) -> (i32, i32) {
    %c0_i32 = arith.constant 0 : i32
    %c0_i32_0 = arith.constant 0 : i32
    return %c0_i32, %arg0 : i32, i32
  }
  func.func @transform_5(%arg0: i32) -> (i32, i32) {
    %c0_i32 = arith.constant 0 : i32
    %c0_i32_0 = arith.constant 0 : i32
    return %arg0, %c0_i32 : i32, i32
  }
}

</mosaic_0001>

<bundles_post_ra>
// kernel: tpu_custom_call.1
= control target key start
LH: loop header
LB: loop body
LE: loop exit
PB: predicated region body
PF: predicated region fallthrough
CT: control target
= control target key end

     0   :  { %12 = vsyncpa [#allocation4], 0  ;;  %vm28_vm0 = vcmask 261120   ;;  %s843_s0 = inlined_call_operand.<no memory space> [shape: f32[1], index: 0, kind: input, shape index: {}]   ;;  %s844_s1 = inlined_call_operand.vmem [shape: f32[16,32], index: 1, kind: input, shape index: {}]   ;;  %s845_s2 = inlined_call_operand.vmem [shape: f32[32,128], index: 2, kind: input, shape index: {}]   ;;  %s846_s3 = inlined_call_operand.vmem [shape: f32[128,8], index: 3, kind: input, shape index: {}]   ;;  %s847_s4 = inlined_call_operand.hbm [shape: s32[1,16], index: 4, kind: output, shape index: {0}]   ;;  %s848_s5 = inlined_call_operand.hbm [shape: f32[1,128], index: 5, kind: output, shape index: {1}]  }
   0x1   :  { %v27_v0 = vld [vmem:[%s845_s2 + $0x18] sm:$0xff]  ;;  %v26_v1 = vld [vmem:[%s845_s2 + $0x10] sm:$0xff]  ;;  %v22_v2 = vld [vmem:[%s844_s1] sm:$0xff] }
   0x2   :  { %575 = vmatprep.subr.mxu0 %v27_v0  ;;  %v25_v3 = vld [vmem:[%s845_s2 + $0x8] sm:$0xff]  ;;  %583 = vmatprep.mubr.msk.f32.mxu0 %vm28_vm0, %v22_v2 }
   0x3   :  { %576 = vmatpush3.msra.mxu0 %v27_v0 }
   0x4   :  { %13 = vsyncpa [#allocation6], 0  ;;  %577 = vmatprep.subr.mxu0 %v26_v1  ;;  %v24_v4 = vld [vmem:[%s845_s2] sm:$0xff]  ;;  %v23_v5 = vld [vmem:[%s844_s1 + $0x8] sm:$0xff]  ;;  %v699_v35 = vmov 0.0   ;;  %v245_v37 = vlaneseq  ;;  %vm700_vm3 = vmmov 1   ;;  %v297_v50 = vstv %s843_s0 }
   0x5   :  { %578 = vmatpush3.msra.mxu0 %v26_v1  ;;  %v137_v6 = vld [vmem:[%s846_s3 + $0x78] sm:$0xff]  ;;  %v136_v7 = vld [vmem:[%s846_s3 + $0x70] sm:$0xff]  ;;  %v135_v8 = vld [vmem:[%s846_s3 + $0x68] sm:$0xff]  ;;  %vm258_vm5 = vcmask 130048   ;;  %vm701_vm7 = vmmov 0   ;;  %vm285_vm8 = vcmask 122880  }
   0x6   :  { %579 = vmatprep.subr.mxu0 %v25_v3  ;;  %586 = vmatprep.subr.mxu1 %v137_v6  ;;  %v134_v9 = vld [vmem:[%s846_s3 + $0x60] sm:$0xff]  ;;  %v133_v10 = vld [vmem:[%s846_s3 + $0x58] sm:$0xff]  ;;  %v132_v15 = vld [vmem:[%s846_s3 + $0x50] sm:$0xff]  ;;  %v246_v38 = vand.u32 127, %v245_v37  ;;  %s702_s0 = smov [#allocation3]  }
   0x7   :  { %580 = vmatpush3.msra.mxu0 %v25_v3  ;;  %587 = vmatpush3.msra.mxu1 %v137_v6  ;;  %v131_v16 = vld [vmem:[%s846_s3 + $0x48] sm:$0xff]  ;;  %v130_v17 = vld [vmem:[%s846_s3 + $0x40] sm:$0xff]  ;;  %v129_v18 = vld [vmem:[%s846_s3 + $0x38] sm:$0xff]  ;;  %s516_s10 = sshll.u32 %s702_s0, 4  ;;  %s517_s10 = int_to_ptr.vmem [resolvable:$true] %s516_s10 }
   0x8   :  { %581 = vmatprep.subr.mxu0 %v24_v4  ;;  %588 = vmatprep.subr.mxu1 %v136_v7  ;;  %v128_v19 = vld [vmem:[%s846_s3 + $0x30] sm:$0xff]  ;;  %v127_v20 = vld [vmem:[%s846_s3 + $0x28] sm:$0xff]  ;;  %v126_v21 = vld [vmem:[%s846_s3 + $0x20] sm:$0xff]  ;;  %vm250_vm1 = vcmp.lt.s32.totalorder %v246_v38, 16  ;;  %s655_s11 = scalar_lea.vmem %s517_s10, 16  ;;  %s659_s12 = scalar_lea.vmem %s517_s10, 32 }
   0x9   :  { %582 = vmatpush3.msra.mxu0 %v24_v4  ;;  %589 = vmatpush3.msra.mxu1 %v136_v7  ;;  %v125_v22 = vld [vmem:[%s846_s3 + $0x18] sm:$0xff]  ;;  %v124_v23 = vld [vmem:[%s846_s3 + $0x10] sm:$0xff]  ;;  %v123_v24 = vld [vmem:[%s846_s3 + $0x8] sm:$0xff]  ;;  %p656_p0 = scmp.ne.s32.totalorder %s517_s10, %s655_s11  ;;  %p660_p1 = scmp.lt.s32.totalorder %s517_s10, %s517_s10 }
   0xa   :  { %584 = vmatmul.mubr.msk.f32.vlgmr.msra.gmra.mxu0 %vm28_vm0, %v23_v5  ;;  %590 = vmatprep.subr.mxu1 %v135_v8  ;;  %v122_v25 = vld [vmem:[%s846_s3] sm:$0xff]  ;;  %p661_p2 = scmp.lt.s32.totalorder %s659_s12, %s655_s11 }
   0xb   :  { %591 = vmatpush3.msra.mxu1 %v135_v8  ;;  %621 = vmatprep.subr.mxu0 %v699_v35 }
   0xc   :  { %592 = vmatprep.subr.mxu1 %v134_v9  ;;  %623 = vmatprep.mubr.msk.f32.mxu0 %vm701_vm7, %v699_v35  ;;  %p662_p3 = por %p661_p2, %p660_p1 }
   0xd   :  { %593 = vmatpush3.msra.mxu1 %v134_v9 }
   0xe   :  { %594 = vmatprep.subr.mxu1 %v133_v10  ;;  %p663_p4 = pnand %p662_p3, %p656_p0 }
   0xf   :  { %595 = vmatpush3.msra.mxu1 %v133_v10 }
  0x10   :  { %596 = vmatprep.subr.mxu1 %v132_v15 }
  0x11   :  { %597 = vmatpush3.msra.mxu1 %v132_v15 }
  0x12   :  { %598 = vmatprep.subr.mxu1 %v131_v16 }
  0x13   :  { %599 = vmatpush3.msra.mxu1 %v131_v16 }
  0x14   :  { %600 = vmatprep.subr.mxu1 %v130_v17 }
  0x15   :  { %601 = vmatpush3.msra.mxu1 %v130_v17 }
  0x16   :  { %602 = vmatprep.subr.mxu1 %v129_v18 }
  0x17   :  { %603 = vmatpush3.msra.mxu1 %v129_v18  ;;  %v540_v18 = vsel %vm250_vm1, 1.0, %v699_v35 }
  0x18   :  { %604 = vmatprep.subr.mxu1 %v128_v19 }
  0x19   :  { %605 = vmatpush3.msra.mxu1 %v128_v19 }
  0x1a   :  { %606 = vmatprep.subr.mxu1 %v127_v20 }
  0x1b   :  { %607 = vmatpush3.msra.mxu1 %v127_v20 }
  0x1c   :  { %608 = vmatprep.subr.mxu1 %v126_v21 }
  0x1d   :  { %609 = vmatpush3.msra.mxu1 %v126_v21 }
  0x1e   :  { %610 = vmatprep.subr.mxu1 %v125_v22 }
  0x1f   :  { %611 = vmatpush3.msra.mxu1 %v125_v22 }
  0x20   :  { %612 = vmatprep.subr.mxu1 %v124_v23 }
  0x21   :  { %613 = vmatpush3.msra.mxu1 %v124_v23 }
  0x22   :  { %614 = vmatprep.subr.mxu1 %v123_v24 }
  0x23   :  { %615 = vmatpush3.msra.mxu1 %v123_v24 }
  0x24   :  { %616 = vmatprep.subr.mxu1 %v122_v25 }
  0x25   :  { %617 = vmatpush3.msra.mxu1 %v122_v25 }
  0xca   :  { %v585_v11 = vpop.f32.mrf.mxu0 }
  0xcb   :  { %v111_v14 = vmul.f32 %v585_v11, %v585_v11 }
  0xcc   :  { %v101_v12 = vpop.f32.mrf.mxu0 }
  0xcd   :  { %v110_v13 = vmul.f32 %v101_v12, %v101_v12 }
  0xcf   :  { %112 = vadd.xlane.f32.xlu0 %v110_v13 }
  0xd3   :  { %114 = vadd.xlane.f32.xlu0 %v111_v14 }
 0x158   :  { %v113_v26 = vpop.xlane.xlu0 %112 }
 0x159   :  { %v116_v27 = vmax.f32 %v113_v26, 1e-08 }
 0x15b   :  { %641 = vrsqrt.f32 %v116_v27 }
 0x15c   :  { %v115_v28 = vpop.xlane.xlu0 %114 }
 0x15d   :  { %v117_v29 = vmax.f32 %v115_v28, 1e-08 }
 0x15f   :  { %643 = vrsqrt.f32 %v117_v29 }
 0x168   :  { %v642_v30 = vpop.eup %641 }
 0x169   :  { %v120_v31 = vmul.f32 %v642_v30, %v101_v12 }
 0x16b   :  { %618 = vmatprep.mubr.f32.mxu1 %v120_v31 }
 0x16c   :  { %v644_v32 = vpop.eup %643 }
 0x16d   :  { %v121_v33 = vmul.f32 %v644_v32, %v585_v11 }
 0x16f   :  { %619 = vmatmul.mubr.f32.vlgmr.msra.gmra.mxu1 %v121_v33 }
 0x22f   :  { %v620_v34 = vpop.f32.mrf.mxu1 }
 0x231   :  { %v204_v36 = vpop.f32.mrf.mxu1 }
 0x232   :  { %213 = vxpose.xlu1.b32.start [1/2] (short) (narrow) %v204_v36, 8 }
 0x236   :  { %214 = vxpose.xlu1.b32.end [2/2] (short) (narrow) %v620_v34, 8  ;;  %v306_v34 = vshrl.u32 %v245_v37, 7 }
 0x2ae   :  { %v229_v39 = vpop.trf.xlu1 }
 0x2af   :  { %vm253_vm2 = vweird.f32 %v229_v39 }
 0x2b0   :  { %vm803_vm4 = vmxor %vm253_vm2, %vm700_vm3 }
 0x2b1   :  { %vm256_vm6 = vmand %vm803_vm4, %vm250_vm1 }
 0x2b2   :  { %v257_v41 = vsel %vm256_vm6, %v229_v39, inf }
 0x2b3   :  { %v259_v42 = vsel %vm258_vm5, %v257_v41, inf }
 0x2b4   :  { %260 = vmin.xlane.f32.xlu0 %v259_v42 }
 0x33d   :  { %v261_v43 = vpop.xlane.xlu0 %260 }
 0x33e   :  { %v262_v44 = vrot.slane %v261_v43, 4 }
 0x340   :  { %v263_v45 = vmin.f32 %v261_v43, %v262_v44 }
 0x342   :  { %v264_v46 = vrot.slane %v263_v45, 2 }
 0x344   :  { %v265_v47 = vmin.f32 %v263_v45, %v264_v46 }
 0x346   :  { %v266_v48 = vrot.slane %v265_v47, 1 }
 0x348   :  { %v267_v49 = vmin.f32 %v265_v47, %v266_v48 }
 0x34a   :  { %631 = vpush %v267_v49 }
 0x37b   :  { %s632_s3 = spop %631 }
 0x37c   :  { %v269_v51 = vstv %s632_s3 }
 0x37d   :  { %v270_v52 = vsel %vm803_vm4, %v229_v39, %v269_v51 }
 0x37e   :  { %v271_v53 = vmax.f32 %v270_v52, 1.1920929e-07  ;;  %v298_v54 = vmul.f32 %v297_v50, %v270_v52  ;;  %v330_v55 = vmul.f32 14.285714, %v270_v52 }
 0x380   :  { %v272_v56 = vmin.f32 %v271_v53, 0.9999999  ;;  %v541_v57 = vmul.f32 -1.442695, %v298_v54  ;;  %v331_v58 = vsel %vm258_vm5, %v330_v55, -inf }
 0x381   :  { %v332_v59 = vrot.slane %v331_v58, 4 }
 0x382   :  { %645 = vlog2.f32 %v272_v56 }
 0x383   :  { %647 = vpow2.f32 %v541_v57  ;;  %v333_v60 = vmax.f32 %v331_v58, %v332_v59 }
 0x385   :  { %v334_v61 = vrot.slane %v333_v60, 2 }
 0x387   :  { %v335_v62 = vmax.f32 %v333_v60, %v334_v61 }
 0x389   :  { %v336_v63 = vrot.slane %v335_v62, 1 }
 0x38b   :  { %v337_v0 = vmax.f32 %v335_v62, %v336_v63 }
 0x38d   :  { %v338_v1 = vsub.f32 %v330_v55, %v337_v0 }
 0x38f   :  { %v646_v2 = vpop.eup %645  ;;  %v339_v3 = vmul.f32 1.442695, %v338_v1 }
 0x390   :  { %v648_v4 = vpop.eup %647  ;;  %v274_v5 = vmul.f32 0.6931472, %v646_v2 }
 0x391   :  { %v302_v6 = vadd.f32 1.0, %v648_v4  ;;  %649 = vpow2.f32 %v339_v3 }
 0x392   :  { %v275_v7 = vmul.f32 %v274_v5, %v270_v52 }
 0x393   :  { %651 = vrcp.f32 %v302_v6 }
 0x394   :  { %v276_v8 = vsel %vm258_vm5, %v275_v7, 0.0 }
 0x395   :  { %v277_v9 = vrot.slane %v276_v8, 4 }
 0x397   :  { %v278_v10 = vadd.f32 %v277_v9, %v276_v8 }
 0x399   :  { %v279_v11 = vrot.slane %v278_v10, 2 }
 0x39b   :  { %v280_v12 = vadd.f32 %v279_v11, %v278_v10 }
 0x39d   :  { %v281_v13 = vrot.slane %v280_v12, 1 }
 0x39e   :  { %v650_v14 = vpop.eup %649 }
 0x39f   :  { %v341_v15 = vsel %vm258_vm5, %v650_v14, 0.0  ;;  %v282_v16 = vadd.f32 %v281_v13, %v280_v12 }
 0x3a0   :  { %v652_v17 = vpop.eup %651  ;;  %v342_v19 = vrot.slane %v341_v15, 4 }
 0x3a1   :  { %v283_v20 = vsub.f32 0.0, %v282_v16  ;;  %v307_v21 = vsel %vm258_vm5, %v652_v17, -inf }
 0x3a2   :  { %v343_v22 = vadd.f32 %v342_v19, %v341_v15  ;;  %v308_v23 = vrot.slane %v307_v21, 4 }
 0x3a3   :  { %v284_v24 = vmul.f32 %v540_v18, %v283_v20 }
 0x3a4   :  { %v344_v25 = vrot.slane %v343_v22, 2  ;;  %v309_v26 = vmax.f32 %v307_v21, %v308_v23 }
 0x3a5   :  { %v286_v27 = vsel %vm285_vm8, %v284_v24, 0.0 }
 0x3a6   :  { %v345_v28 = vadd.f32 %v344_v25, %v343_v22  ;;  %287 = vadd.xlane.f32.xlu1 %v286_v27  ;;  %v310_v29 = vrot.slane %v309_v26, 2 }
 0x3a8   :  { %v346_v30 = vrot.slane %v345_v28, 1  ;;  %v311_v31 = vmax.f32 %v309_v26, %v310_v29 }
 0x3aa   :  { %v347_v32 = vadd.f32 %v346_v30, %v345_v28  ;;  %v312_v33 = vrot.slane %v311_v31, 1 }
 0x3ac   :  { %653 = vrcp.f32 %v347_v32  ;;  %v313_v36 = vmax.f32 %v311_v31, %v312_v33 }
 0x3ae   :  { %vm314_vm9 = vcmp.ge.f32.partialorder %v652_v17, %v313_v36 }
 0x3af   :  { %v315_v38 = vsel %vm314_vm9, %v306_v34, 8 }
 0x3b0   :  { %v316_v39 = vsel %vm258_vm5, %v315_v38, 2147483647 }
 0x3b1   :  { %v317_v40 = vrot.slane %v316_v39, 4 }
 0x3b3   :  { %vm318_vm10 = vcmp.lt.s32.totalorder %v316_v39, %v317_v40 }
 0x3b4   :  { %v319_v41 = vsel %vm318_vm10, %v316_v39, %v317_v40 }
 0x3b5   :  { %v320_v42 = vrot.slane %v319_v41, 2 }
 0x3b7   :  { %vm321_vm11 = vcmp.lt.s32.totalorder %v319_v41, %v320_v42 }
 0x3b8   :  { %v322_v43 = vsel %vm321_vm11, %v319_v41, %v320_v42 }
 0x3b9   :  { %v654_v44 = vpop.eup %653  ;;  %v323_v45 = vrot.slane %v322_v43, 1 }
 0x3ba   :  { %v349_v46 = vmul.f32 %v654_v44, %v650_v14 }
 0x3bb   :  { %vm324_vm12 = vcmp.lt.s32.totalorder %v322_v43, %v323_v45 }
 0x3bc   :  { %622 = vmatpush3.xpose.msk.msra.mxu0 %vm258_vm5, %v349_v46  ;;  %v325_v47 = vsel %vm324_vm12, %v322_v43, %v323_v45 }
 0x3bd   :  { %626 = vmatprep.subr.mxu0 %v699_v35  ;;  %vm327_vm13 = vcmp.eq.s32.totalorder %v306_v34, %v325_v47  ;;  %326 = vst.msk [vmem:[#allocation3] sm:$0x1] %vm285_vm8, %v325_v47 }
 0x3be   :  { %v542_v37 = vsel %vm327_vm13, 1.0, %v699_v35 }
 0x3bf   :  { %624 = vmatmul.mubr.msk.f32.vlgmr.msra.gmra.mxu0 %vm258_vm5, %v540_v18 }
 0x3c0   :  { %627 = vmatpush3.xpose.msk.msra.mxu0 %vm258_vm5, %v542_v37  ;;  %628 = vmatprep.mubr.msk.f32.mxu0 %vm701_vm7, %v699_v35 }
 0x3c3   :  { %629 = vmatmul.mubr.msk.f32.vlgmr.msra.gmra.mxu0 %vm258_vm5, %v540_v18 }
 0x42f   :  { %v288_v48 = vpop.xlane.xlu1 %287 }
 0x430   :  { %v289_v49 = vrot.slane %v288_v48, 4 }
 0x432   :  { %v290_v50 = vadd.f32 %v289_v49, %v288_v48 }
 0x434   :  { %v291_v51 = vrot.slane %v290_v50, 2 }
 0x436   :  { %v292_v52 = vadd.f32 %v291_v51, %v290_v50 }
 0x438   :  { %v293_v53 = vrot.slane %v292_v52, 1 }
 0x43a   :  { %v294_v54 = vadd.f32 %v293_v53, %v292_v52 }
 0x43c   :  { %633 = vpush %v294_v54 }
 0x43d   :  { %666 = shalt.err (!%p663_p4)
}
 0x43e   :  { %519 = dma.vmem_to_hbm [thread:$0]  %s517_s10, 16, %s847_s4, [#allocation4]   ;;  %vm504_vm14 = vcmask 64512   ;;  %vm507_vm15 = vcmask 138240  }
 0x43f   :  { %s703_s15 = smov 8   ;;  %s704_s17 = smov [#allocation5]  }
 0x440   :  { %s526_s18 = sshll.u32 %s704_s17, 4  ;;  %s527_s18 = int_to_ptr.vmem [resolvable:$true] %s526_s18 }
 0x441   :  { %s675_s4 = scalar_lea.vmem %s527_s18, 16  ;;  %s679_s19 = scalar_lea.vmem %s527_s18, 32 }
 0x442   :  { %p676_p5 = scmp.ne.s32.totalorder %s527_s18, %s675_s4  ;;  %p680_p6 = scmp.lt.s32.totalorder %s527_s18, %s527_s18 }
 0x443   :  { %p681_p7 = scmp.lt.s32.totalorder %s679_s19, %s675_s4 }
 0x445   :  { %p682_p8 = por %p681_p7, %p680_p6 }
 0x447   :  { %p683_p9 = pnand %p682_p8, %p676_p5 }
 0x46d   :  { %s634_s16 = spop %633 }
 0x46e   :  { %v499_v59 = vstv %s634_s16 }
 0x47f   :  { %v422_v35 = vpop.f32.mrf.mxu0 }
 0x481   :  { %v625_v55 = vpop.f32.mrf.mxu0 }
 0x483   :  { %v495_v56 = vpop.f32.mrf.mxu0 }
 0x484   :  { %501 = vrot.lane.b32.xlu0 %v495_v56, %s703_s15 }
 0x485   :  { %v630_v57 = vpop.f32.mrf.mxu0 }
 0x4f6   :  { %v502_v58 = vpop.permute.xlu0 %501 }
 0x4f7   :  { %v505_v60 = vsel %vm504_vm14, %v422_v35, %v502_v58 }
 0x4f8   :  { %v506_v61 = vsel %vm258_vm5, %v505_v60, %v499_v59 }
 0x4f9   :  { %v508_v62 = vsel %vm507_vm15, %v506_v61, 0.0 }
 0x4fa   :  { %509 = vst [vmem:[#allocation5] sm:$0x1] %v508_v62 }
 0x4fb   :  { %686 = shalt.err (!%p683_p9)
}
 0x4fc   :  { %529 = dma.vmem_to_hbm [thread:$0]  %s527_s18, 16, %s848_s5, [#allocation6]  }
 0x4fd   :  { %695 = dma.done.wait [#allocation4], 16  }
 0x4fe   :  { %696 = vsyncadd [#allocation4], 4294967280 }
 0x4ff   :  { %697 = dma.done.wait [#allocation6], 16  }
 0x500   :  { %698 = vsyncadd [#allocation6], 4294967280 }
 0x501   :  { %536 = vsyncpa [#allocation4], 1 }
 0x502   :  { %537 = vsyncpa [#allocation6], 1 }

// kernel: tpu_custom_call.1
= control target key start
LH: loop header
LB: loop body
LE: loop exit
PB: predicated region body
PF: predicated region fallthrough
CT: control target
= control target key end

     0   :  { %12 = vsyncpa [#allocation4], 0  ;;  %vm28_vm0 = vcmask 261120   ;;  %s843_s0 = inlined_call_operand.<no memory space> [shape: f32[1], index: 0, kind: input, shape index: {}]   ;;  %s844_s1 = inlined_call_operand.vmem [shape: f32[16,32], index: 1, kind: input, shape index: {}]   ;;  %s845_s2 = inlined_call_operand.vmem [shape: f32[32,128], index: 2, kind: input, shape index: {}]   ;;  %s846_s3 = inlined_call_operand.vmem [shape: f32[128,8], index: 3, kind: input, shape index: {}]   ;;  %s847_s4 = inlined_call_operand.hbm [shape: s32[1,16], index: 4, kind: output, shape index: {0}]   ;;  %s848_s5 = inlined_call_operand.hbm [shape: f32[1,128], index: 5, kind: output, shape index: {1}]  }
   0x1   :  { %v27_v0 = vld [vmem:[%s845_s2 + $0x18] sm:$0xff]  ;;  %v26_v1 = vld [vmem:[%s845_s2 + $0x10] sm:$0xff]  ;;  %v22_v2 = vld [vmem:[%s844_s1] sm:$0xff] }
   0x2   :  { %575 = vmatprep.subr.mxu0 %v27_v0  ;;  %v25_v3 = vld [vmem:[%s845_s2 + $0x8] sm:$0xff]  ;;  %583 = vmatprep.mubr.msk.f32.mxu0 %vm28_vm0, %v22_v2 }
   0x3   :  { %576 = vmatpush3.msra.mxu0 %v27_v0 }
   0x4   :  { %13 = vsyncpa [#allocation6], 0  ;;  %577 = vmatprep.subr.mxu0 %v26_v1  ;;  %v24_v4 = vld [vmem:[%s845_s2] sm:$0xff]  ;;  %v23_v5 = vld [vmem:[%s844_s1 + $0x8] sm:$0xff]  ;;  %v699_v35 = vmov 0.0   ;;  %v245_v37 = vlaneseq  ;;  %vm700_vm3 = vmmov 1   ;;  %v297_v50 = vstv %s843_s0 }
   0x5   :  { %578 = vmatpush3.msra.mxu0 %v26_v1  ;;  %v137_v6 = vld [vmem:[%s846_s3 + $0x78] sm:$0xff]  ;;  %v136_v7 = vld [vmem:[%s846_s3 + $0x70] sm:$0xff]  ;;  %v135_v8 = vld [vmem:[%s846_s3 + $0x68] sm:$0xff]  ;;  %vm258_vm5 = vcmask 130048   ;;  %vm701_vm7 = vmmov 0   ;;  %vm285_vm8 = vcmask 122880  }
   0x6   :  { %579 = vmatprep.subr.mxu0 %v25_v3  ;;  %586 = vmatprep.subr.mxu1 %v137_v6  ;;  %v134_v9 = vld [vmem:[%s846_s3 + $0x60] sm:$0xff]  ;;  %v133_v10 = vld [vmem:[%s846_s3 + $0x58] sm:$0xff]  ;;  %v132_v15 = vld [vmem:[%s846_s3 + $0x50] sm:$0xff]  ;;  %v246_v38 = vand.u32 127, %v245_v37  ;;  %s702_s0 = smov [#allocation3]  }
   0x7   :  { %580 = vmatpush3.msra.mxu0 %v25_v3  ;;  %587 = vmatpush3.msra.mxu1 %v137_v6  ;;  %v131_v16 = vld [vmem:[%s846_s3 + $0x48] sm:$0xff]  ;;  %v130_v17 = vld [vmem:[%s846_s3 + $0x40] sm:$0xff]  ;;  %v129_v18 = vld [vmem:[%s846_s3 + $0x38] sm:$0xff]  ;;  %s516_s10 = sshll.u32 %s702_s0, 4  ;;  %s517_s10 = int_to_ptr.vmem [resolvable:$true] %s516_s10 }
   0x8   :  { %581 = vmatprep.subr.mxu0 %v24_v4  ;;  %588 = vmatprep.subr.mxu1 %v136_v7  ;;  %v128_v19 = vld [vmem:[%s846_s3 + $0x30] sm:$0xff]  ;;  %v127_v20 = vld [vmem:[%s846_s3 + $0x28] sm:$0xff]  ;;  %v126_v21 = vld [vmem:[%s846_s3 + $0x20] sm:$0xff]  ;;  %vm250_vm1 = vcmp.lt.s32.totalorder %v246_v38, 16  ;;  %s655_s11 = scalar_lea.vmem %s517_s10, 16  ;;  %s659_s12 = scalar_lea.vmem %s517_s10, 32 }
   0x9   :  { %582 = vmatpush3.msra.mxu0 %v24_v4  ;;  %589 = vmatpush3.msra.mxu1 %v136_v7  ;;  %v125_v22 = vld [vmem:[%s846_s3 + $0x18] sm:$0xff]  ;;  %v124_v23 = vld [vmem:[%s846_s3 + $0x10] sm:$0xff]  ;;  %v123_v24 = vld [vmem:[%s846_s3 + $0x8] sm:$0xff]  ;;  %p656_p0 = scmp.ne.s32.totalorder %s517_s10, %s655_s11  ;;  %p660_p1 = scmp.lt.s32.totalorder %s517_s10, %s517_s10 }
   0xa   :  { %584 = vmatmul.mubr.msk.f32.vlgmr.msra.gmra.mxu0 %vm28_vm0, %v23_v5  ;;  %590 = vmatprep.subr.mxu1 %v135_v8  ;;  %v122_v25 = vld [vmem:[%s846_s3] sm:$0xff]  ;;  %p661_p2 = scmp.lt.s32.totalorder %s659_s12, %s655_s11 }
   0xb   :  { %591 = vmatpush3.msra.mxu1 %v135_v8  ;;  %621 = vmatprep.subr.mxu0 %v699_v35 }
   0xc   :  { %592 = vmatprep.subr.mxu1 %v134_v9  ;;  %623 = vmatprep.mubr.msk.f32.mxu0 %vm701_vm7, %v699_v35  ;;  %p662_p3 = por %p661_p2, %p660_p1 }
   0xd   :  { %593 = vmatpush3.msra.mxu1 %v134_v9 }
   0xe   :  { %594 = vmatprep.subr.mxu1 %v133_v10  ;;  %p663_p4 = pnand %p662_p3, %p656_p0 }
   0xf   :  { %595 = vmatpush3.msra.mxu1 %v133_v10 }
  0x10   :  { %596 = vmatprep.subr.mxu1 %v132_v15 }
  0x11   :  { %597 = vmatpush3.msra.mxu1 %v132_v15 }
  0x12   :  { %598 = vmatprep.subr.mxu1 %v131_v16 }
  0x13   :  { %599 = vmatpush3.msra.mxu1 %v131_v16 }
  0x14   :  { %600 = vmatprep.subr.mxu1 %v130_v17 }
  0x15   :  { %601 = vmatpush3.msra.mxu1 %v130_v17 }
  0x16   :  { %602 = vmatprep.subr.mxu1 %v129_v18 }
  0x17   :  { %603 = vmatpush3.msra.mxu1 %v129_v18  ;;  %v540_v18 = vsel %vm250_vm1, 1.0, %v699_v35 }
  0x18   :  { %604 = vmatprep.subr.mxu1 %v128_v19 }
  0x19   :  { %605 = vmatpush3.msra.mxu1 %v128_v19 }
  0x1a   :  { %606 = vmatprep.subr.mxu1 %v127_v20 }
  0x1b   :  { %607 = vmatpush3.msra.mxu1 %v127_v20 }
  0x1c   :  { %608 = vmatprep.subr.mxu1 %v126_v21 }
  0x1d   :  { %609 = vmatpush3.msra.mxu1 %v126_v21 }
  0x1e   :  { %610 = vmatprep.subr.mxu1 %v125_v22 }
  0x1f   :  { %611 = vmatpush3.msra.mxu1 %v125_v22 }
  0x20   :  { %612 = vmatprep.subr.mxu1 %v124_v23 }
  0x21   :  { %613 = vmatpush3.msra.mxu1 %v124_v23 }
  0x22   :  { %614 = vmatprep.subr.mxu1 %v123_v24 }
  0x23   :  { %615 = vmatpush3.msra.mxu1 %v123_v24 }
  0x24   :  { %616 = vmatprep.subr.mxu1 %v122_v25 }
  0x25   :  { %617 = vmatpush3.msra.mxu1 %v122_v25 }
  0xca   :  { %v585_v11 = vpop.f32.mrf.mxu0 }
  0xcb   :  { %v111_v14 = vmul.f32 %v585_v11, %v585_v11 }
  0xcc   :  { %v101_v12 = vpop.f32.mrf.mxu0 }
  0xcd   :  { %v110_v13 = vmul.f32 %v101_v12, %v101_v12 }
  0xcf   :  { %112 = vadd.xlane.f32.xlu0 %v110_v13 }
  0xd3   :  { %114 = vadd.xlane.f32.xlu0 %v111_v14 }
 0x158   :  { %v113_v26 = vpop.xlane.xlu0 %112 }
 0x159   :  { %v116_v27 = vmax.f32 %v113_v26, 1e-08 }
 0x15b   :  { %641 = vrsqrt.f32 %v116_v27 }
 0x15c   :  { %v115_v28 = vpop.xlane.xlu0 %114 }
 0x15d   :  { %v117_v29 = vmax.f32 %v115_v28, 1e-08 }
 0x15f   :  { %643 = vrsqrt.f32 %v117_v29 }
 0x168   :  { %v642_v30 = vpop.eup %641 }
 0x169   :  { %v120_v31 = vmul.f32 %v642_v30, %v101_v12 }
 0x16b   :  { %618 = vmatprep.mubr.f32.mxu1 %v120_v31 }
 0x16c   :  { %v644_v32 = vpop.eup %643 }
 0x16d   :  { %v121_v33 = vmul.f32 %v644_v32, %v585_v11 }
 0x16f   :  { %619 = vmatmul.mubr.f32.vlgmr.msra.gmra.mxu1 %v121_v33 }
 0x22f   :  { %v620_v34 = vpop.f32.mrf.mxu1 }
 0x231   :  { %v204_v36 = vpop.f32.mrf.mxu1 }
 0x232   :  { %213 = vxpose.xlu1.b32.start [1/2] (short) (narrow) %v204_v36, 8 }
 0x236   :  { %214 = vxpose.xlu1.b32.end [2/2] (short) (narrow) %v620_v34, 8  ;;  %v306_v34 = vshrl.u32 %v245_v37, 7 }
 0x2ae   :  { %v229_v39 = vpop.trf.xlu1 }
 0x2af   :  { %vm253_vm2 = vweird.f32 %v229_v39 }
 0x2b0   :  { %vm803_vm4 = vmxor %vm253_vm2, %vm700_vm3 }
 0x2b1   :  { %vm256_vm6 = vmand %vm803_vm4, %vm250_vm1 }
 0x2b2   :  { %v257_v41 = vsel %vm256_vm6, %v229_v39, inf }
 0x2b3   :  { %v259_v42 = vsel %vm258_vm5, %v257_v41, inf }
 0x2b4   :  { %260 = vmin.xlane.f32.xlu0 %v259_v42 }
 0x33d   :  { %v261_v43 = vpop.xlane.xlu0 %260 }
 0x33e   :  { %v262_v44 = vrot.slane %v261_v43, 4 }
 0x340   :  { %v263_v45 = vmin.f32 %v261_v43, %v262_v44 }
 0x342   :  { %v264_v46 = vrot.slane %v263_v45, 2 }
 0x344   :  { %v265_v47 = vmin.f32 %v263_v45, %v264_v46 }
 0x346   :  { %v266_v48 = vrot.slane %v265_v47, 1 }
 0x348   :  { %v267_v49 = vmin.f32 %v265_v47, %v266_v48 }
 0x34a   :  { %631 = vpush %v267_v49 }
 0x37b   :  { %s632_s3 = spop %631 }
 0x37c   :  { %v269_v51 = vstv %s632_s3 }
 0x37d   :  { %v270_v52 = vsel %vm803_vm4, %v229_v39, %v269_v51 }
 0x37e   :  { %v271_v53 = vmax.f32 %v270_v52, 1.1920929e-07  ;;  %v298_v54 = vmul.f32 %v297_v50, %v270_v52  ;;  %v330_v55 = vmul.f32 14.285714, %v270_v52 }
 0x380   :  { %v272_v56 = vmin.f32 %v271_v53, 0.9999999  ;;  %v541_v57 = vmul.f32 -1.442695, %v298_v54  ;;  %v331_v58 = vsel %vm258_vm5, %v330_v55, -inf }
 0x381   :  { %v332_v59 = vrot.slane %v331_v58, 4 }
 0x382   :  { %645 = vlog2.f32 %v272_v56 }
 0x383   :  { %647 = vpow2.f32 %v541_v57  ;;  %v333_v60 = vmax.f32 %v331_v58, %v332_v59 }
 0x385   :  { %v334_v61 = vrot.slane %v333_v60, 2 }
 0x387   :  { %v335_v62 = vmax.f32 %v333_v60, %v334_v61 }
 0x389   :  { %v336_v63 = vrot.slane %v335_v62, 1 }
 0x38b   :  { %v337_v0 = vmax.f32 %v335_v62, %v336_v63 }
 0x38d   :  { %v338_v1 = vsub.f32 %v330_v55, %v337_v0 }
 0x38f   :  { %v646_v2 = vpop.eup %645  ;;  %v339_v3 = vmul.f32 1.442695, %v338_v1 }
 0x390   :  { %v648_v4 = vpop.eup %647  ;;  %v274_v5 = vmul.f32 0.6931472, %v646_v2 }
 0x391   :  { %v302_v6 = vadd.f32 1.0, %v648_v4  ;;  %649 = vpow2.f32 %v339_v3 }
 0x392   :  { %v275_v7 = vmul.f32 %v274_v5, %v270_v52 }
 0x393   :  { %651 = vrcp.f32 %v302_v6 }
 0x394   :  { %v276_v8 = vsel %vm258_vm5, %v275_v7, 0.0 }
 0x395   :  { %v277_v9 = vrot.slane %v276_v8, 4 }
 0x397   :  { %v278_v10 = vadd.f32 %v277_v9, %v276_v8 }
 0x399   :  { %v279_v11 = vrot.slane %v278_v10, 2 }
 0x39b   :  { %v280_v12 = vadd.f32 %v279_v11, %v278_v10 }
 0x39d   :  { %v281_v13 = vrot.slane %v280_v12, 1 }
 0x39e   :  { %v650_v14 = vpop.eup %649 }
 0x39f   :  { %v341_v15 = vsel %vm258_vm5, %v650_v14, 0.0  ;;  %v282_v16 = vadd.f32 %v281_v13, %v280_v12 }
 0x3a0   :  { %v652_v17 = vpop.eup %651  ;;  %v342_v19 = vrot.slane %v341_v15, 4 }
 0x3a1   :  { %v283_v20 = vsub.f32 0.0, %v282_v16  ;;  %v307_v21 = vsel %vm258_vm5, %v652_v17, -inf }
 0x3a2   :  { %v343_v22 = vadd.f32 %v342_v19, %v341_v15  ;;  %v308_v23 = vrot.slane %v307_v21, 4 }
 0x3a3   :  { %v284_v24 = vmul.f32 %v540_v18, %v283_v20 }
 0x3a4   :  { %v344_v25 = vrot.slane %v343_v22, 2  ;;  %v309_v26 = vmax.f32 %v307_v21, %v308_v23 }
 0x3a5   :  { %v286_v27 = vsel %vm285_vm8, %v284_v24, 0.0 }
 0x3a6   :  { %v345_v28 = vadd.f32 %v344_v25, %v343_v22  ;;  %287 = vadd.xlane.f32.xlu1 %v286_v27  ;;  %v310_v29 = vrot.slane %v309_v26, 2 }
 0x3a8   :  { %v346_v30 = vrot.slane %v345_v28, 1  ;;  %v311_v31 = vmax.f32 %v309_v26, %v310_v29 }
 0x3aa   :  { %v347_v32 = vadd.f32 %v346_v30, %v345_v28  ;;  %v312_v33 = vrot.slane %v311_v31, 1 }
 0x3ac   :  { %653 = vrcp.f32 %v347_v32  ;;  %v313_v36 = vmax.f32 %v311_v31, %v312_v33 }
 0x3ae   :  { %vm314_vm9 = vcmp.ge.f32.partialorder %v652_v17, %v313_v36 }
 0x3af   :  { %v315_v38 = vsel %vm314_vm9, %v306_v34, 8 }
 0x3b0   :  { %v316_v39 = vsel %vm258_vm5, %v315_v38, 2147483647 }
 0x3b1   :  { %v317_v40 = vrot.slane %v316_v39, 4 }
 0x3b3   :  { %vm318_vm10 = vcmp.lt.s32.totalorder %v316_v39, %v317_v40 }
 0x3b4   :  { %v319_v41 = vsel %vm318_vm10, %v316_v39, %v317_v40 }
 0x3b5   :  { %v320_v42 = vrot.slane %v319_v41, 2 }
 0x3b7   :  { %vm321_vm11 = vcmp.lt.s32.totalorder %v319_v41, %v320_v42 }
 0x3b8   :  { %v322_v43 = vsel %vm321_vm11, %v319_v41, %v320_v42 }
 0x3b9   :  { %v654_v44 = vpop.eup %653  ;;  %v323_v45 = vrot.slane %v322_v43, 1 }
 0x3ba   :  { %v349_v46 = vmul.f32 %v654_v44, %v650_v14 }
 0x3bb   :  { %vm324_vm12 = vcmp.lt.s32.totalorder %v322_v43, %v323_v45 }
 0x3bc   :  { %622 = vmatpush3.xpose.msk.msra.mxu0 %vm258_vm5, %v349_v46  ;;  %v325_v47 = vsel %vm324_vm12, %v322_v43, %v323_v45 }
 0x3bd   :  { %626 = vmatprep.subr.mxu0 %v699_v35  ;;  %vm327_vm13 = vcmp.eq.s32.totalorder %v306_v34, %v325_v47  ;;  %326 = vst.msk [vmem:[#allocation3] sm:$0x1] %vm285_vm8, %v325_v47 }
 0x3be   :  { %v542_v37 = vsel %vm327_vm13, 1.0, %v699_v35 }
 0x3bf   :  { %624 = vmatmul.mubr.msk.f32.vlgmr.msra.gmra.mxu0 %vm258_vm5, %v540_v18 }
 0x3c0   :  { %627 = vmatpush3.xpose.msk.msra.mxu0 %vm258_vm5, %v542_v37  ;;  %628 = vmatprep.mubr.msk.f32.mxu0 %vm701_vm7, %v699_v35 }
 0x3c3   :  { %629 = vmatmul.mubr.msk.f32.vlgmr.msra.gmra.mxu0 %vm258_vm5, %v540_v18 }
 0x42f   :  { %v288_v48 = vpop.xlane.xlu1 %287 }
 0x430   :  { %v289_v49 = vrot.slane %v288_v48, 4 }
 0x432   :  { %v290_v50 = vadd.f32 %v289_v49, %v288_v48 }
 0x434   :  { %v291_v51 = vrot.slane %v290_v50, 2 }
 0x436   :  { %v292_v52 = vadd.f32 %v291_v51, %v290_v50 }
 0x438   :  { %v293_v53 = vrot.slane %v292_v52, 1 }
 0x43a   :  { %v294_v54 = vadd.f32 %v293_v53, %v292_v52 }
 0x43c   :  { %633 = vpush %v294_v54 }
 0x43d   :  { %666 = shalt.err (!%p663_p4)
}
 0x43e   :  { %519 = dma.vmem_to_hbm [thread:$0]  %s517_s10, 16, %s847_s4, [#allocation4]   ;;  %vm504_vm14 = vcmask 64512   ;;  %vm507_vm15 = vcmask 138240  }
 0x43f   :  { %s703_s15 = smov 8   ;;  %s704_s17 = smov [#allocation5]  }
 0x440   :  { %s526_s18 = sshll.u32 %s704_s17, 4  ;;  %s527_s18 = int_to_ptr.vmem [resolvable:$true] %s526_s18 }
 0x441   :  { %s675_s4 = scalar_lea.vmem %s527_s18, 16  ;;  %s679_s19 = scalar_lea.vmem %s527_s18, 32 }
 0x442   :  { %p676_p5 = scmp.ne.s32.totalorder %s527_s18, %s675_s4  ;;  %p680_p6 = scmp.lt.s32.totalorder %s527_s18, %s527_s18 }
 0x443   :  { %p681_p7 = scmp.lt.s32.totalorder %s679_s19, %s675_s4 }
 0x445   :  { %p682_p8 = por %p681_p7, %p680_p6 }
 0x447   :  { %p683_p9 = pnand %p682_p8, %p676_p5 }
 0x46d   :  { %s634_s16 = spop %633 }
 0x46e   :  { %v499_v59 = vstv %s634_s16 }
 0x47f   :  { %v422_v35 = vpop.f32.mrf.mxu0 }
 0x481   :  { %v625_v55 = vpop.f32.mrf.mxu0 }
 0x483   :  { %v495_v56 = vpop.f32.mrf.mxu0 }
 0x484   :  { %501 = vrot.lane.b32.xlu0 %v495_v56, %s703_s15 }
 0x485   :  { %v630_v57 = vpop.f32.mrf.mxu0 }
 0x4f6   :  { %v502_v58 = vpop.permute.xlu0 %501 }
 0x4f7   :  { %v505_v60 = vsel %vm504_vm14, %v422_v35, %v502_v58 }
 0x4f8   :  { %v506_v61 = vsel %vm258_vm5, %v505_v60, %v499_v59 }
 0x4f9   :  { %v508_v62 = vsel %vm507_vm15, %v506_v61, 0.0 }
 0x4fa   :  { %509 = vst [vmem:[#allocation5] sm:$0x1] %v508_v62 }
 0x4fb   :  { %686 = shalt.err (!%p683_p9)
}
 0x4fc   :  { %529 = dma.vmem_to_hbm [thread:$0]  %s527_s18, 16, %s848_s5, [#allocation6]  }
 0x4fd   :  { %695 = dma.done.wait [#allocation4], 16  }
 0x4fe   :  { %696 = vsyncadd [#allocation4], 4294967280 }
 0x4ff   :  { %697 = dma.done.wait [#allocation6], 16  }
 0x500   :  { %698 = vsyncadd [#allocation6], 4294967280 }
 0x501   :  { %536 = vsyncpa [#allocation4], 1 }
 0x502   :  { %537 = vsyncpa [#allocation6], 1 }

</bundles_post_ra>
